<compile_context>
chip_gen: v5e
topology: v5e:2x2
jax: 0.10.0
libtpu: 0.0.40
codegen_flags: <defaults>
</compile_context>

<pallas_src>
import functools
from typing import Optional

import jax
import jax.numpy as jnp
from jax import lax
from jax.experimental import pallas as pl
from jax.experimental.pallas import tpu as pltpu

_LANE = 128
_ACC_W = 128                              # lane width of the running accumulators
_L_TILE_MAX = 8192                        # reduction tile width (multiple of 128)
_VMEM_OPERAND_BUDGET = 12 * 1024 * 1024   # double-buffered operand bytes (v5e-safe)


def _round_up(x: int, m: int) -> int:
    return ((x + m - 1) // m) * m


def _cdiv(a: int, b: int) -> int:
    return -(-a // b)


def _sublane_multiple(dtype) -> int:
    # Native sublane packing: 8 rows for 4-byte dtypes, 16 for 2-byte, 32 for 1-byte.
    return {4: 8, 2: 16, 1: 32}.get(jnp.dtype(dtype).itemsize, 8)


# ----------------------------- kernel -----------------------------------------


def _rmsd_kernel(*refs, has_q: bool, has_mask: bool, root: bool,
                 multi_k: bool, ragged_l: bool, l_tile: int, true_l: int,
                 d_coord: float, n_atoms: float):
    """Gridded RMSD reduction.

    Grid: (batch tiles [parallel], reduction tiles [arbitrary]).
    Ref order: p, [q], [mask_expanded], out, [num_acc, [den_acc]].
    Coordinate / mask blocks are lane-dense (B_tile, L_tile) with L = N*D.
    """
    idx = 0
    p_ref = refs[idx]; idx += 1
    q_ref = None
    if has_q:
        q_ref = refs[idx]; idx += 1
    m_ref = None
    if has_mask:
        m_ref = refs[idx]; idx += 1
    out_ref = refs[idx]; idx += 1
    num_acc = den_acc = None
    if multi_k:
        num_acc = refs[idx]; idx += 1
        if has_mask:
            den_acc = refs[idx]; idx += 1

    k = pl.program_id(1)

    p = p_ref[...].astype(jnp.float32)
    if has_q:
        d = p - q_ref[...].astype(jnp.float32)
    else:
        d = p                                   # Q is implicitly zeros
    sq = d * d                                  # (B_tile, L_tile), lane-dense

    if has_mask:
        m = m_ref[...].astype(jnp.float32)      # expanded mask, same layout
        num_c = sq * m
    else:
        m = None
        num_c = sq

    if ragged_l:
        # Last reduction tile hangs past the true L: the out-of-bounds lanes hold
        # unspecified data, so select (not multiply) them to exact zero.
        lane = lax.broadcasted_iota(jnp.int32, num_c.shape, 1)
        valid = lane < (true_l - k * l_tile)
        num_c = jnp.where(valid, num_c, 0.0)
        if has_mask:
            m = jnp.where(valid, m, 0.0)

    def _finalize(num, den):
        if has_mask:
            # den is the sum of the D-expanded mask; divide by D (exact for 0/1).
            msd = num / (den / d_coord + 1e-6)
        else:
            msd = num / n_atoms
        if root:
            msd = jnp.sqrt(msd + 1e-6)
        out_ref[...] = msd

    if not multi_k:
        # Single reduction step: reduce directly, no scratch needed.
        num = jnp.sum(num_c, axis=1, keepdims=True)
        den = jnp.sum(m, axis=1, keepdims=True) if has_mask else None
        _finalize(num, den)
        return

    @pl.when(k == 0)
    def _init():
        num_acc[...] = jnp.zeros_like(num_acc)
        if has_mask:
            den_acc[...] = jnp.zeros_like(den_acc)

    # Fold the tile down to the 128-lane accumulators with pure VPU adds
    # (static, 128-aligned lane slices); the cross-lane (XLU) reduction happens
    # exactly once, in the finalize block.
    n_chunks = l_tile // _ACC_W
    num_fold = num_c[:, :_ACC_W]
    den_fold = m[:, :_ACC_W] if has_mask else None
    for c in range(1, n_chunks):
        s = c * _ACC_W
        num_fold = num_fold + num_c[:, s:s + _ACC_W]
        if has_mask:
            den_fold = den_fold + m[:, s:s + _ACC_W]
    num_acc[...] += num_fold
    if has_mask:
        den_acc[...] += den_fold

    @pl.when(k == pl.num_programs(1) - 1)
    def _done():
        num = jnp.sum(num_acc[...], axis=1, keepdims=True)
        den = jnp.sum(den_acc[...], axis=1, keepdims=True) if has_mask else None
        _finalize(num, den)


# ----------------------------- wrapper -----------------------------------------


def rmsd_pallas(P: jax.Array,
                Q: Optional[jax.Array] = None,
                mask: Optional[jax.Array] = None,
                root: bool = True) -> jax.Array:
    """Pallas TPU RMSD.  P, Q: (B, N, D); mask: (B, N) or None.  Returns (B,)."""
    P = jnp.asarray(P)
    B, N, D = P.shape
    L = N * D

    has_q = Q is not None
    has_mask = mask is not None

    operands = [P.reshape(B, L)]                  # free, contiguous reshape
    if has_q:
        operands.append(jnp.asarray(Q).reshape(B, L))
    if has_mask:
        mask = jnp.asarray(mask)
        if mask.dtype == jnp.bool_ or jnp.issubdtype(mask.dtype, jnp.integer):
            mask = mask.astype(jnp.int8)          # narrowest exact stream for 0/1 masks
        elif mask.dtype == jnp.float64:
            mask = mask.astype(jnp.float32)
        # Expand to the flattened atom-major layout (wrapper pass, narrow dtype).
        # TODO(synk): expand in-kernel from the unexpanded (B, N) mask once a
        # lane-expansion (repeat/gather along lanes) lowering is verified.
        operands.append(jnp.repeat(mask, D, axis=1))

    # --- lane (reduction) axis tiling: full L if it fits, else 8192-wide tiles
    # with the ragged remainder handled in-kernel (no padding). ---
    if L <= _L_TILE_MAX:
        L_tile, nl = L, 1
    else:
        L_tile, nl = _L_TILE_MAX, _cdiv(L, _L_TILE_MAX)

    # --- batch (sublane) axis tiling: no padding; tile rows are either the full
    # batch or a multiple of the widest native sublane packing; the ragged last
    # tile's out-of-bounds rows are simply discarded after the call. ---
    bytes_per_col = sum(jnp.dtype(x.dtype).itemsize for x in operands)
    max_tile_elems = max(_LANE, _VMEM_OPERAND_BUDGET // (2 * bytes_per_col))
    sub = max(_sublane_multiple(x.dtype) for x in operands)
    rows_fit = max(1, max_tile_elems // L_tile)

    if B <= rows_fit:
        if B >= 2 * sub:
            # >= 2 parallel batch tiles so a megacore part (v7x) gets work on
            # both TensorCores; harmless elsewhere (steps stay large).
            B_tile = _round_up(_cdiv(B, 2), sub)
        else:
            B_tile = B
            # TODO(synk): for tiny B on v7x, fold the reduction axis into
            # sublanes ((B, L) -> (B*f, L/f)) so both TensorCores get a tile.
    else:
        B_tile = min(B, max(sub, (rows_fit // sub) * sub))
    nb = _cdiv(B, B_tile)

    multi_k = nl > 1
    ragged_l = multi_k and (L % L_tile != 0)

    kernel = functools.partial(
        _rmsd_kernel,
        has_q=has_q, has_mask=has_mask, root=root,
        multi_k=multi_k, ragged_l=ragged_l, l_tile=L_tile, true_l=L,
        d_coord=float(D), n_atoms=float(N))

    tile_spec = pl.BlockSpec((B_tile, L_tile), lambda i, k: (i, k))
    in_specs = [tile_spec] * len(operands)

    scratch_shapes = []
    if multi_k:
        scratch_shapes.append(pltpu.VMEM((B_tile, _ACC_W), jnp.float32))
        if has_mask:
            scratch_shapes.append(pltpu.VMEM((B_tile, _ACC_W), jnp.float32))

    # Allocate whole output blocks (tiny) so the last batch tile never needs a
    # partial writeback; the wrapper slices the valid rows.
    out_rows = nb * B_tile
    io_bytes = sum(x.size * jnp.dtype(x.dtype).itemsize for x in operands) + out_rows * 4
    cost = pl.CostEstimate(flops=5 * B * L,
                           transcendentals=B if root else 0,
                           bytes_accessed=io_bytes)

    out = pl.pallas_call(
        kernel,
        out_shape=jax.ShapeDtypeStruct((out_rows, 1), jnp.float32),
        grid=(nb, nl),
        in_specs=in_specs,
        out_specs=pl.BlockSpec((B_tile, 1), lambda i, k: (i, 0)),
        scratch_shapes=scratch_shapes,
        compiler_params=pltpu.CompilerParams(
            dimension_semantics=("parallel", "arbitrary")),
        cost_estimate=cost,
    )(*operands)

    return out[:B, 0]


def rmsd_forward(batch: dict,
                 prediction_name: str,
                 target_name: Optional[str] = None,
                 mask_name: Optional[str] = None,
                 root: bool = True,
                 name: str = "rmsd") -> dict:
    """Mirrors RMSD.forward: writes the per-batch loss into batch['losses'][name]."""
    P = batch[prediction_name]
    Q = batch[target_name] if target_name is not None else None   # no zeros tensor streamed
    mask = batch[mask_name] if mask_name is not None else None
    batch.setdefault("losses", {})
    batch["losses"][name] = rmsd_pallas(P, Q, mask, root=root)
    return batch


# ----------------------------- reference / demo --------------------------------


def _reference(P, Q, mask, root):
    P = P.astype(jnp.float32)
    Q = jnp.zeros_like(P) if Q is None else Q.astype(jnp.float32)
    sq = jnp.sum((P - Q) ** 2, axis=-1)
    if mask is not None:
        m = mask.astype(jnp.float32)
        r = jnp.sum(sq * m, axis=1) / (jnp.sum(m, axis=1) + 1e-6)
    else:
        r = jnp.mean(sq, axis=1)
    return jnp.sqrt(r + 1e-6) if root else r


if __name__ == "__main__":
    key = jax.random.PRNGKey(0)
    ks = jax.random.split(key, 8)

    # Small case mirroring the module: coords (B, N, 3), mask (B, N).
    B, N, D = 2, 8, 3
    P = jax.random.normal(ks[0], (B, N, D), dtype=jnp.float32)
    Q = jax.random.normal(ks[1], (B, N, D), dtype=jnp.float32)
    mask = (jax.random.uniform(ks[2], (B, N)) > 0.3).astype(jnp.float32)

    # 1) masked (float weight mask), with sqrt, via the module-style forward().
    batch = {"pred_coords": P, "target_coords": Q, "atom_mask": mask}
    batch = rmsd_forward(batch, "pred_coords", "target_coords", "atom_mask",
                         root=True, name="rmsd")
    loss_masked = jax.block_until_ready(batch["losses"]["rmsd"])
    assert loss_masked.shape == (B,)
    assert jnp.allclose(loss_masked, _reference(P, Q, mask, True),
                        atol=1e-5, rtol=1e-5)

    # 2) unmasked, no sqrt.
    loss_unmasked = jax.block_until_ready(rmsd_pallas(P, Q, mask=None, root=False))
    assert jnp.allclose(loss_unmasked, _reference(P, Q, None, False),
                        atol=1e-5, rtol=1e-5)

    # 3) target_name=None path (no zeros streamed) with a bool mask (int8 stream).
    bmask = jax.random.uniform(ks[3], (B, N)) > 0.5
    loss_self = jax.block_until_ready(rmsd_pallas(P, None, bmask, root=True))
    assert jnp.allclose(loss_self,
                        _reference(P, None, bmask.astype(jnp.float32), True),
                        atol=1e-5, rtol=1e-5)

    # 4) ragged batch (B=80 -> 64 + 16-row tiles, no padding), 2 parallel batch
    #    tiles, single-step reduction, int8 mask stream.
    B2, N2 = 80, 700
    P2 = jax.random.normal(ks[4], (B2, N2, D), dtype=jnp.float32)
    Q2 = jax.random.normal(ks[5], (B2, N2, D), dtype=jnp.float32)
    mask2 = jax.random.uniform(ks[6], (B2, N2)) > 0.5
    loss2 = jax.block_until_ready(rmsd_pallas(P2, Q2, mask2, root=True))
    assert loss2.shape == (B2,)
    assert jnp.allclose(loss2,
                        _reference(P2, Q2, mask2.astype(jnp.float32), True),
                        atol=1e-4, rtol=1e-4)

    # 5) multi-step reduction with a ragged last lane tile (L = 9000 > 8192):
    #    exercises the lane-wide accumulators, iota masking and pl.when finalize.
    B3, N3 = 4, 3000
    P3 = jax.random.normal(ks[7], (B3, N3, D), dtype=jnp.float32)
    mask3 = jax.random.uniform(jax.random.PRNGKey(1), (B3, N3)) > 0.4
    loss3 = jax.block_until_ready(rmsd_pallas(P3, None, mask3, root=False))
    assert jnp.allclose(loss3,
                        _reference(P3, None, mask3.astype(jnp.float32), False),
                        atol=1e-4, rtol=1e-4)

    print("KERNEL_OK")
</pallas_src>

<mosaic_0001>
module attributes {stable_mosaic.version = 11 : i64} {
  func.func @_rmsd_kernel(%arg0: i32, %arg1: i32, %arg2: memref<2x24xf32, #tpu.memory_space<vmem>>, %arg3: memref<2x24xf32, #tpu.memory_space<vmem>>, %arg4: memref<2x24xf32, #tpu.memory_space<vmem>>, %arg5: memref<2x1xf32, #tpu.memory_space<vmem>>) attributes {dimension_semantics = [#tpu.dimension_semantics<parallel>, #tpu.dimension_semantics<arbitrary>], iteration_bounds = array<i64: 1, 1>, scalar_prefetch = 0 : i64, scratch_operands = 0 : i64, tpu.core_type = #tpu.core_type<tc>, window_params = [{transform_indices = @transform_0, window_bounds = array<i64: 2, 24>}, {transform_indices = @transform_1, window_bounds = array<i64: 2, 24>}, {transform_indices = @transform_2, window_bounds = array<i64: 2, 24>}, {transform_indices = @transform_3, window_bounds = array<i64: 2, 1>}]} {
    %c0 = arith.constant 0 : index
    %c0_0 = arith.constant 0 : index
    %0 = vector.load %arg2[%c0, %c0_0] : memref<2x24xf32, #tpu.memory_space<vmem>>, vector<2x24xf32>
    %c0_1 = arith.constant 0 : index
    %c0_2 = arith.constant 0 : index
    %1 = vector.load %arg3[%c0_1, %c0_2] : memref<2x24xf32, #tpu.memory_space<vmem>>, vector<2x24xf32>
    %2 = arith.subf %0, %1 : vector<2x24xf32>
    %3 = arith.mulf %2, %2 : vector<2x24xf32>
    %c0_3 = arith.constant 0 : index
    %c0_4 = arith.constant 0 : index
    %4 = vector.load %arg4[%c0_3, %c0_4] : memref<2x24xf32, #tpu.memory_space<vmem>>, vector<2x24xf32>
    %5 = arith.mulf %3, %4 : vector<2x24xf32>
    %cst = arith.constant dense<0.000000e+00> : vector<2xf32>
    %6 = vector.multi_reduction <add>, %5, %cst [1] : vector<2x24xf32> to vector<2xf32>
    %7 = vector.shape_cast %6 : vector<2xf32> to vector<2x1xf32>
    %cst_5 = arith.constant dense<0.000000e+00> : vector<2xf32>
    %8 = vector.multi_reduction <add>, %4, %cst_5 [1] : vector<2x24xf32> to vector<2xf32>
    %9 = vector.shape_cast %8 : vector<2xf32> to vector<2x1xf32>
    %cst_6 = arith.constant 3.000000e+00 : f32
    %10 = vector.broadcast %cst_6 : f32 to vector<2x1xf32>
    %11 = arith.divf %9, %10 : vector<2x1xf32>
    %cst_7 = arith.constant 9.99999997E-7 : f32
    %12 = vector.broadcast %cst_7 : f32 to vector<2x1xf32>
    %13 = arith.addf %11, %12 : vector<2x1xf32>
    %14 = arith.divf %7, %13 : vector<2x1xf32>
    %cst_8 = arith.constant 9.99999997E-7 : f32
    %15 = vector.broadcast %cst_8 : f32 to vector<2x1xf32>
    %16 = arith.addf %14, %15 : vector<2x1xf32>
    %17 = math.sqrt %16 : vector<2x1xf32>
    %c0_9 = arith.constant 0 : index
    %c0_10 = arith.constant 0 : index
    %18 = vector.load %arg5[%c0_9, %c0_10] : memref<2x1xf32, #tpu.memory_space<vmem>>, vector<2x1xf32>
    tpu.vector_store %arg5[%c0_9, %c0_10], %17 {strides = array<i32>} : memref<2x1xf32, #tpu.memory_space<vmem>>, vector<2x1xf32>,
    return
  }
  func.func @transform_0(%arg0: i32, %arg1: i32) -> (i32, i32) {
    %c0_i32 = arith.constant 0 : i32
    return %arg0, %arg1 : i32, i32
  }
  func.func @transform_1(%arg0: i32, %arg1: i32) -> (i32, i32) {
    %c0_i32 = arith.constant 0 : i32
    return %arg0, %arg1 : i32, i32
  }
  func.func @transform_2(%arg0: i32, %arg1: i32) -> (i32, i32) {
    %c0_i32 = arith.constant 0 : i32
    return %arg0, %arg1 : i32, i32
  }
  func.func @transform_3(%arg0: i32, %arg1: i32) -> (i32, i32) {
    %c0_i32 = arith.constant 0 : i32
    %c0_i32_0 = arith.constant 0 : i32
    return %arg0, %c0_i32 : i32, i32
  }
}

</mosaic_0001>

<bundles_post_ra>
// kernel: tpu_custom_call.1
= control target key start
LH: loop header
LB: loop body
LE: loop exit
PB: predicated region body
PF: predicated region fallthrough
CT: control target
= control target key end

     0   :  { %8 = vsyncpa [#allocation3], 0  ;;  %s235_s0 = inlined_call_operand.hbm [shape: f32[2,24], index: 0, kind: input, shape index: {}]   ;;  %s236_s1 = inlined_call_operand.hbm [shape: f32[2,24], index: 1, kind: input, shape index: {}]   ;;  %s237_s2 = inlined_call_operand.hbm [shape: f32[2,24], index: 2, kind: input, shape index: {}]   ;;  %s238_s3 = inlined_call_operand.vmem [shape: f32[2,1], index: 3, kind: output, shape index: {}]  }
   0x1   :  { %9 = vsyncpa [#allocation5], 0  ;;  %s26_s14 = sshll.u32 %s236_s1, 4  ;;  %s199_s15 = smov [#allocation4]   ;;  %s27_s14 = int_to_ptr.hbm [resolvable:$true] %s26_s14 }
   0x2   :  { %s28_s16 = sshll.u32 %s199_s15, 4  ;;  %s15_s19 = sshll.u32 %s235_s0, 4  ;;  %s29_s16 = int_to_ptr.vmem [resolvable:$true] %s28_s16  ;;  %s16_s19 = int_to_ptr.hbm [resolvable:$true] %s15_s19 }
   0x3   :  { %31 = dma.hbm_to_vmem [thread:$0]  %s27_s14, 32, %s29_s16, [#allocation5]  }
   0x4   :  { %s200_s20 = smov [#allocation2]   ;;  %s37_s24 = sshll.u32 %s237_s2, 4  ;;  %s38_s24 = int_to_ptr.hbm [resolvable:$true] %s37_s24 }
   0x5   :  { %s17_s21 = sshll.u32 %s200_s20, 4  ;;  %s201_s1 = smov [#allocation6]   ;;  %s18_s21 = int_to_ptr.vmem [resolvable:$true] %s17_s21 }
   0x6   :  { %20 = dma.hbm_to_vmem [thread:$0]  %s16_s19, 32, %s18_s21, [#allocation3]  }
   0x7   :  { %s39_s25 = sshll.u32 %s201_s1, 4  ;;  %s40_s25 = int_to_ptr.vmem [resolvable:$true] %s39_s25 }
   0x8   :  { %42 = dma.hbm_to_vmem [thread:$0]  %s38_s24, 32, %s40_s25, [#allocation5]  }
   0x9   :  { %195 = dma.done.wait [#allocation3], 32  }
   0xa   :  { %196 = vsyncadd [#allocation3], 4294967264 }
   0xb   :  { %197 = dma.done.wait [#allocation5], 64  }
   0xc   :  { %198 = vsyncadd [#allocation5], 4294967232  ;;  %vm61_vm0 = vcmask 189440   ;;  %v59_v0 = vld [vmem:[#allocation6] sm:$0x3]  ;;  %v202_v8 = vmov 3.0  }
   0xd   :  { %v55_v1 = vld [vmem:[#allocation2] sm:$0x3]  ;;  %v56_v2 = vld [vmem:[#allocation4] sm:$0x3]  ;;  %v65_v3 = vsel %vm61_vm0, %v59_v0, 0.0  ;;  %117 = vrcp.f32 %v202_v8  ;;  %vm105_vm6 = vcmask 1024  }
   0xe   :  { %v57_v4 = vsub.f32 %v55_v1, %v56_v2  ;;  %66 = vadd.xlane.f32.xlu0 %v65_v3 }
  0x10   :  { %v58_v5 = vmul.f32 %v57_v4, %v57_v4 }
  0x12   :  { %v60_v6 = vmul.f32 %v59_v0, %v58_v5 }
  0x13   :  { %v118_v9 = vpop.eup %117 }
  0x14   :  { %v62_v7 = vsel %vm61_vm0, %v60_v6, 0.0  ;;  %v69_v10 = vmul.f32 3.0, %v118_v9  ;;  %vm73_vm1 = vweird.f32 %v118_v9 }
  0x16   :  { %63 = vadd.xlane.f32.xlu0 %v62_v7  ;;  %v70_v11 = vsub.f32 1.0, %v69_v10 }
  0x18   :  { %v71_v12 = vmul.f32 %v118_v9, %v70_v11 }
  0x1a   :  { %v72_v13 = vadd.f32 %v118_v9, %v71_v12 }
  0x1c   :  { %v74_v14 = vsel %vm73_vm1, %v118_v9, %v72_v13 }
  0x81   :  { %v67_v15 = vpop.xlane.xlu0 %66 }
  0x82   :  { %v75_v16 = vmul.f32 %v74_v14, %v67_v15 }
  0x84   :  { %v76_v17 = vadd.f32 1e-06, %v75_v16 }
  0x86   :  { %119 = vrcp.f32 %v76_v17  ;;  %v88_v21 = vand.u32 2147483648, %v76_v17  ;;  %v86_v23 = vand.u32 2147483647, %v76_v17  ;;  %vm82_vm3 = vweird.f32 %v76_v17 }
  0x88   :  { %v89_v25 = vor.u32 1.1754944e-38, %v88_v21  ;;  %vm87_vm5 = vcmp.eq.f32.partialorder %v86_v23, 8.507059e+37 }
  0x89   :  { %v64_v26 = vpop.xlane.xlu0 %63 }
  0x8c   :  { %v120_v18 = vpop.eup %119 }
  0x8d   :  { %v78_v19 = vmul.f32 %v120_v18, %v76_v17  ;;  %vm83_vm2 = vweird.f32 %v120_v18 }
  0x8e   :  { %vm84_vm4 = vmor %vm82_vm3, %vm83_vm2 }
  0x8f   :  { %v79_v20 = vsub.f32 1.0, %v78_v19 }
  0x91   :  { %v80_v22 = vmul.f32 %v120_v18, %v79_v20 }
  0x93   :  { %v81_v24 = vadd.f32 %v120_v18, %v80_v22 }
  0x95   :  { %v85_v27 = vsel %vm84_vm4, %v120_v18, %v81_v24 }
  0x96   :  { %v90_v28 = vsel %vm87_vm5, %v89_v25, %v85_v27 }
  0x97   :  { %v91_v29 = vmul.f32 %v90_v28, %v64_v26 }
  0x99   :  { %v92_v30 = vadd.f32 1e-06, %v91_v29 }
  0x9b   :  { %121 = vrsqrt.f32 %v92_v30  ;;  %vm100_vm7 = vcmp.eq.f32.partialorder %v92_v30, inf  ;;  %v103_v38 = vand.u32 2147483648, %v92_v30  ;;  %vm102_vm8 = vcmp.eq.f32.partialorder %v92_v30, 0.0 }
  0xa1   :  { %v122_v31 = vpop.eup %121 }
  0xa2   :  { %v94_v32 = vmul.f32 %v122_v31, %v92_v30 }
  0xa4   :  { %v95_v33 = vmul.f32 %v122_v31, %v94_v32 }
  0xa6   :  { %v96_v34 = vmul.f32 0.5, %v95_v33 }
  0xa8   :  { %v97_v35 = vsub.f32 1.5, %v96_v34 }
  0xaa   :  { %v98_v36 = vmul.f32 %v122_v31, %v97_v35 }
  0xac   :  { %v99_v37 = vmul.f32 %v98_v36, %v92_v30 }
  0xae   :  { %v101_v39 = vsel %vm100_vm7, %v92_v30, %v99_v37 }
  0xaf   :  { %v104_v40 = vsel %vm102_vm8, %v103_v38, %v101_v39 }
  0xb0   :  { %106 = vst.msk [vmem:[%s238_s3] sm:$0x3] %vm105_vm6, %v104_v40 }
  0xb1   :  { %111 = vsyncpa [#allocation3], 1 }
  0xb2   :  { %112 = vsyncpa [#allocation5], 1 }

</bundles_post_ra>
